<compile_context>
chip_gen: v6e
topology: v6e:2x2x1
jax: 0.10.0
libtpu: 0.0.40
codegen_flags: <defaults>
</compile_context>

<pallas_src>
import functools
import math

import numpy as np

import jax
import jax.numpy as jnp
from jax.experimental import pallas as pl
from jax.experimental.pallas import tpu as pltpu


def _wmsa_kernel(x_ref, wqkv_ref, bqkv_ref, rpb_ref, mask_ref,
                 wproj_ref, bproj_ref, o_ref, *, num_heads, head_dim, scale):
    """One window-batch tile: fused qkv -> per-head attention -> fused proj."""
    x = x_ref[0]                                   # (N, C)
    n, c = x.shape
    h, ds = num_heads, head_dim

    # Fused QKV projection: a single wide MXU matmul (N, C) x (C, 3C).
    # Column layout matches the PyTorch reshape(B_, N, 3, H, ds): [q | k | v],
    # each head-major.
    qkv = (jnp.dot(x, wqkv_ref[...], preferred_element_type=jnp.float32)
           + bqkv_ref[...])                        # (N, 3C)

    mask = mask_ref[0]                             # (N, N) additive window mask

    outs = []
    for i in range(h):                             # static unroll over heads
        qh = qkv[:, i * ds:(i + 1) * ds] * scale           # (N, ds), scale on q
        kh = qkv[:, c + i * ds:c + (i + 1) * ds]           # (N, ds)
        vh = qkv[:, 2 * c + i * ds:2 * c + (i + 1) * ds]   # (N, ds)

        # scores: contract the head dim directly (no explicit k transpose)
        s = jax.lax.dot_general(qh, kh, (((1,), (1,)), ((), ())),
                                preferred_element_type=jnp.float32)   # (N, N)
        s = s + rpb_ref[i] + mask

        # numerically-stable softmax over the key axis
        s = s - jnp.max(s, axis=-1, keepdims=True)
        p = jnp.exp(s)
        p = p * pl.reciprocal(jnp.sum(p, axis=-1, keepdims=True), approx=True)

        outs.append(jnp.dot(p, vh, preferred_element_type=jnp.float32))  # (N, ds)

    # head-concat in the lane dim, then one fused output projection and a
    # single lane-dense (N, C) store.
    o = jnp.concatenate(outs, axis=1)              # (N, C), head-major channels
    o_ref[0] = (jnp.dot(o, wproj_ref[...], preferred_element_type=jnp.float32)
                + bproj_ref[...]).astype(o_ref.dtype)


def window_attention3d_pallas(x, qkv_w, qkv_b, proj_w, proj_b,
                              rpb_table, rel_pos_index, mask=None, *, num_heads):
    """Forward of WindowAttention3D (eval mode: dropout rates are 0).

    x:             (B_, N, C)   with B_ = num_windows * batch
    qkv_w, qkv_b:  (3C, C), (3C,)      nn.Linear layout (out = x @ W.T + b)
    proj_w, proj_b:(C, C), (C,)
    rpb_table:     ((2Wd-1)(2Wh-1)(2Ww-1), H)
    rel_pos_index: (Wd*Wh*Ww, Wd*Wh*Ww) int32
    mask:          (nW, N, N) additive (0 / -inf-style) mask, or None
    """
    B_, N, C = x.shape
    H = num_heads
    ds = C // H
    scale = ds ** (-0.5)

    # TODO(synk): the relative-position-bias table gather, and the
    # fragment-bias (fmask) / resized_window_size branches, are handled here in
    # JAX glue (batch-independent); only the standard mask path is lowered to
    # Pallas.  attn_drop / proj_drop are identity at inference (rate 0.0).
    rpi = rel_pos_index[:N, :N].reshape(-1)
    rpb = rpb_table[rpi].reshape(N, N, H)
    rpb = jnp.transpose(rpb, (2, 0, 1)).astype(jnp.float32)          # (H, N, N)

    if mask is None:
        mask = jnp.zeros((1, N, N), jnp.float32)
    mask = mask.astype(jnp.float32)
    nW = mask.shape[0]
    assert B_ % nW == 0, "B_ must be a multiple of the number of windows"

    wqkv_t = jnp.transpose(qkv_w).astype(jnp.float32)                # (C, 3C)
    bqkv = qkv_b.reshape(1, 3 * C).astype(jnp.float32)
    wproj_t = jnp.transpose(proj_w).astype(jnp.float32)              # (C, C)
    bproj = proj_b.reshape(1, C).astype(jnp.float32)

    kernel = functools.partial(_wmsa_kernel, num_heads=H, head_dim=ds,
                               scale=scale)

    return pl.pallas_call(
        kernel,
        out_shape=jax.ShapeDtypeStruct((B_, N, C), x.dtype),
        grid_spec=pltpu.PrefetchScalarGridSpec(
            num_scalar_prefetch=0,
            grid=(B_ // nW, nW),
            in_specs=[
                pl.BlockSpec((1, N, C), lambda bo, w: (bo * nW + w, 0, 0)),  # x
                pl.BlockSpec((C, 3 * C), lambda bo, w: (0, 0)),              # Wqkv^T
                pl.BlockSpec((1, 3 * C), lambda bo, w: (0, 0)),              # bqkv
                pl.BlockSpec((H, N, N), lambda bo, w: (0, 0, 0)),            # rel-pos bias
                pl.BlockSpec((1, N, N), lambda bo, w: (w, 0, 0)),            # per-window mask
                pl.BlockSpec((C, C), lambda bo, w: (0, 0)),                  # Wproj^T
                pl.BlockSpec((1, C), lambda bo, w: (0, 0)),                  # bproj
            ],
            out_specs=pl.BlockSpec((1, N, C), lambda bo, w: (bo * nW + w, 0, 0)),
        ),
        compiler_params=pltpu.CompilerParams(
            dimension_semantics=("parallel", "parallel")),
    )(x, wqkv_t, bqkv, rpb, mask, wproj_t, bproj)


def _relative_position_index(window_size):
    """numpy transcription of the PyTorch __init__ buffer computation."""
    wd, wh, ww = window_size
    coords = np.stack(np.meshgrid(np.arange(wd), np.arange(wh), np.arange(ww),
                                  indexing="ij"))                    # (3,Wd,Wh,Ww)
    coords_flatten = coords.reshape(3, -1)                           # (3, N)
    rel = coords_flatten[:, :, None] - coords_flatten[:, None, :]    # (3, N, N)
    rel = rel.transpose(1, 2, 0).astype(np.int64)                    # (N, N, 3)
    rel[:, :, 0] += wd - 1
    rel[:, :, 1] += wh - 1
    rel[:, :, 2] += ww - 1
    rel[:, :, 0] *= (2 * wh - 1) * (2 * ww - 1)
    rel[:, :, 1] *= 2 * ww - 1
    return rel.sum(-1)                                               # (N, N)


def window_attention3d_ref(x, qkv_w, qkv_b, proj_w, proj_b,
                           rpb_table, rel_pos_index, mask, *, num_heads):
    """Pure-JAX transcription of the PyTorch forward (for verification)."""
    B_, N, C = x.shape
    H = num_heads
    ds = C // H
    scale = ds ** (-0.5)

    qkv = (x @ qkv_w.T + qkv_b).reshape(B_, N, 3, H, ds)
    qkv = jnp.transpose(qkv, (2, 0, 3, 1, 4))
    q, k, v = qkv[0] * scale, qkv[1], qkv[2]

    attn = jnp.einsum('bhnd,bhmd->bhnm', q, k)

    rpi = rel_pos_index[:N, :N].reshape(-1)
    rpb = rpb_table[rpi].reshape(N, N, H)
    rpb = jnp.transpose(rpb, (2, 0, 1))
    attn = attn + rpb[None]

    if mask is not None:
        nW = mask.shape[0]
        attn = attn.reshape(B_ // nW, nW, H, N, N) + mask[None, :, None]
        attn = attn.reshape(B_, H, N, N)
    attn = jax.nn.softmax(attn, axis=-1)

    out = jnp.einsum('bhnm,bhmd->bhnd', attn, v)
    out = jnp.transpose(out, (0, 2, 1, 3)).reshape(B_, N, C)
    return out @ proj_w.T + proj_b


if __name__ == "__main__":
    dim, num_heads = 32, 4
    window_size = (2, 4, 4)
    N = window_size[0] * window_size[1] * window_size[2]       # 32
    B, nW = 2, 2
    B_ = B * nW                                                # num_windows * batch

    rel_pos_index = jnp.asarray(_relative_position_index(window_size), jnp.int32)

    key = jax.random.PRNGKey(0)
    kx, kqw, kqb, kpw, kpb, kt, km = jax.random.split(key, 7)

    x = jax.random.normal(kx, (B_, N, dim), jnp.float32)

    bound = 1.0 / math.sqrt(dim)       # nn.Linear default init range
    qkv_w = jax.random.uniform(kqw, (3 * dim, dim), jnp.float32, -bound, bound)
    qkv_b = jax.random.uniform(kqb, (3 * dim,), jnp.float32, -bound, bound)
    proj_w = jax.random.uniform(kpw, (dim, dim), jnp.float32, -bound, bound)
    proj_b = jax.random.uniform(kpb, (dim,), jnp.float32, -bound, bound)

    n_rel = ((2 * window_size[0] - 1) * (2 * window_size[1] - 1)
             * (2 * window_size[2] - 1))
    rpb_table = 0.02 * jax.random.normal(kt, (n_rel, num_heads), jnp.float32)

    # shifted-window style additive mask: 0 where attended, -100 where blocked
    mask = jnp.where(jax.random.uniform(km, (nW, N, N)) < 0.15,
                     -100.0, 0.0).astype(jnp.float32)

    fwd = jax.jit(functools.partial(window_attention3d_pallas,
                                    num_heads=num_heads))
    out = fwd(x, qkv_w, qkv_b, proj_w, proj_b, rpb_table, rel_pos_index, mask)
    jax.block_until_ready(out)

    out_ref = window_attention3d_ref(x, qkv_w, qkv_b, proj_w, proj_b,
                                     rpb_table, rel_pos_index, mask,
                                     num_heads=num_heads)
    assert out.shape == (B_, N, dim)
    # tolerance slightly relaxed because the softmax denominator uses the EUP
    # approximate reciprocal (pl.reciprocal(..., approx=True)).
    err = float(jnp.max(jnp.abs(out - out_ref)))
    assert jnp.allclose(out, out_ref, atol=5e-3, rtol=5e-3), err

    print("KERNEL_OK")
</pallas_src>

<mosaic_0001>
module attributes {stable_mosaic.version = 11 : i64} {
  func.func @_wmsa_kernel(%arg0: i32, %arg1: i32, %arg2: memref<1x32x32xf32, #tpu.memory_space<vmem>>, %arg3: memref<32x96xf32, #tpu.memory_space<vmem>>, %arg4: memref<1x96xf32, #tpu.memory_space<vmem>>, %arg5: memref<4x32x32xf32, #tpu.memory_space<vmem>>, %arg6: memref<1x32x32xf32, #tpu.memory_space<vmem>>, %arg7: memref<32x32xf32, #tpu.memory_space<vmem>>, %arg8: memref<1x32xf32, #tpu.memory_space<vmem>>, %arg9: memref<1x32x32xf32, #tpu.memory_space<vmem>>) attributes {dimension_semantics = [#tpu.dimension_semantics<parallel>, #tpu.dimension_semantics<parallel>], iteration_bounds = array<i64: 2, 2>, scalar_prefetch = 0 : i64, scratch_operands = 0 : i64, tpu.core_type = #tpu.core_type<tc>, window_params = [{transform_indices = @transform_0, window_bounds = array<i64: 1, 32, 32>}, {pipeline_mode = #tpu.pipeline_mode<synchronous>, transform_indices = @transform_1, window_bounds = array<i64: 32, 96>}, {pipeline_mode = #tpu.pipeline_mode<synchronous>, transform_indices = @transform_2, window_bounds = array<i64: 1, 96>}, {pipeline_mode = #tpu.pipeline_mode<synchronous>, transform_indices = @transform_3, window_bounds = array<i64: 4, 32, 32>}, {transform_indices = @transform_4, window_bounds = array<i64: 1, 32, 32>}, {pipeline_mode = #tpu.pipeline_mode<synchronous>, transform_indices = @transform_5, window_bounds = array<i64: 32, 32>}, {pipeline_mode = #tpu.pipeline_mode<synchronous>, transform_indices = @transform_6, window_bounds = array<i64: 1, 32>}, {transform_indices = @transform_7, window_bounds = array<i64: 1, 32, 32>}]} {
    %c0 = arith.constant 0 : index
    %c0_0 = arith.constant 0 : index
    %c0_1 = arith.constant 0 : index
    %0 = vector.load %arg2[%c0, %c0_0, %c0_1] : memref<1x32x32xf32, #tpu.memory_space<vmem>>, vector<1x32x32xf32>
    %1 = vector.shape_cast %0 : vector<1x32x32xf32> to vector<32x32xf32>
    %c0_2 = arith.constant 0 : index
    %c0_3 = arith.constant 0 : index
    %2 = vector.load %arg3[%c0_2, %c0_3] : memref<32x96xf32, #tpu.memory_space<vmem>>, vector<32x96xf32>
    %cst = arith.constant dense<0.000000e+00> : vector<32x96xf32>
    %3 = tpu.matmul %1, %2, %cst {dimension_numbers = #tpu.dot_dimension_numbers<[1], [0], [0], [1], [0, 0, 1, 1], [], []>} : vector<32x32xf32>, vector<32x96xf32>, vector<32x96xf32> -> vector<32x96xf32>
    %c0_4 = arith.constant 0 : index
    %c0_5 = arith.constant 0 : index
    %4 = vector.load %arg4[%c0_4, %c0_5] : memref<1x96xf32, #tpu.memory_space<vmem>>, vector<1x96xf32>
    %5 = vector.broadcast %4 : vector<1x96xf32> to vector<32x96xf32>
    %6 = arith.addf %3, %5 : vector<32x96xf32>
    %c0_6 = arith.constant 0 : index
    %c0_7 = arith.constant 0 : index
    %c0_8 = arith.constant 0 : index
    %7 = vector.load %arg6[%c0_6, %c0_7, %c0_8] : memref<1x32x32xf32, #tpu.memory_space<vmem>>, vector<1x32x32xf32>
    %8 = vector.shape_cast %7 : vector<1x32x32xf32> to vector<32x32xf32>
    %9 = vector.extract_strided_slice %6 {offsets = [0, 0], sizes = [32, 8], strides = [1, 1]} : vector<32x96xf32> to vector<32x8xf32>
    %cst_9 = arith.constant 0.353553385 : f32
    %10 = vector.broadcast %cst_9 : f32 to vector<32x8xf32>
    %11 = arith.mulf %9, %10 : vector<32x8xf32>
    %12 = vector.extract_strided_slice %6 {offsets = [0, 32], sizes = [32, 8], strides = [1, 1]} : vector<32x96xf32> to vector<32x8xf32>
    %13 = vector.extract_strided_slice %6 {offsets = [0, 64], sizes = [32, 8], strides = [1, 1]} : vector<32x96xf32> to vector<32x8xf32>
    %cst_10 = arith.constant dense<0.000000e+00> : vector<32x32xf32>
    %14 = tpu.matmul %11, %12, %cst_10 {dimension_numbers = #tpu.dot_dimension_numbers<[1], [1], [0], [0], [0, 0, 1, 0], [], []>} : vector<32x8xf32>, vector<32x8xf32>, vector<32x32xf32> -> vector<32x32xf32>
    %c0_11 = arith.constant 0 : index
    %c0_12 = arith.constant 0 : index
    %c0_13 = arith.constant 0 : index
    %15 = vector.load %arg5[%c0_11, %c0_12, %c0_13] : memref<4x32x32xf32, #tpu.memory_space<vmem>>, vector<1x32x32xf32>
    %16 = vector.shape_cast %15 : vector<1x32x32xf32> to vector<32x32xf32>
    %17 = arith.addf %14, %16 : vector<32x32xf32>
    %18 = arith.addf %17, %8 : vector<32x32xf32>
    %cst_14 = arith.constant dense<0xFF800000> : vector<32xf32>
    %19 = vector.multi_reduction <maximumf>, %18, %cst_14 [1] : vector<32x32xf32> to vector<32xf32>
    %20 = vector.shape_cast %19 : vector<32xf32> to vector<32x1xf32>
    %21 = vector.broadcast %20 : vector<32x1xf32> to vector<32x32xf32>
    %22 = arith.subf %18, %21 : vector<32x32xf32>
    %23 = math.exp %22 : vector<32x32xf32>
    %cst_15 = arith.constant dense<0.000000e+00> : vector<32xf32>
    %24 = vector.multi_reduction <add>, %23, %cst_15 [1] : vector<32x32xf32> to vector<32xf32>
    %25 = vector.shape_cast %24 : vector<32xf32> to vector<32x1xf32>
    %26 = tpu.reciprocal %25 {approx = true} : vector<32x1xf32> -> vector<32x1xf32>
    %27 = vector.broadcast %26 : vector<32x1xf32> to vector<32x32xf32>
    %28 = arith.mulf %23, %27 : vector<32x32xf32>
    %cst_16 = arith.constant dense<0.000000e+00> : vector<32x8xf32>
    %29 = tpu.matmul %28, %13, %cst_16 {dimension_numbers = #tpu.dot_dimension_numbers<[1], [0], [0], [1], [0, 0, 1, 1], [], []>} : vector<32x32xf32>, vector<32x8xf32>, vector<32x8xf32> -> vector<32x8xf32>
    %30 = vector.extract_strided_slice %6 {offsets = [0, 8], sizes = [32, 8], strides = [1, 1]} : vector<32x96xf32> to vector<32x8xf32>
    %cst_17 = arith.constant 0.353553385 : f32
    %31 = vector.broadcast %cst_17 : f32 to vector<32x8xf32>
    %32 = arith.mulf %30, %31 : vector<32x8xf32>
    %33 = vector.extract_strided_slice %6 {offsets = [0, 40], sizes = [32, 8], strides = [1, 1]} : vector<32x96xf32> to vector<32x8xf32>
    %34 = vector.extract_strided_slice %6 {offsets = [0, 72], sizes = [32, 8], strides = [1, 1]} : vector<32x96xf32> to vector<32x8xf32>
    %cst_18 = arith.constant dense<0.000000e+00> : vector<32x32xf32>
    %35 = tpu.matmul %32, %33, %cst_18 {dimension_numbers = #tpu.dot_dimension_numbers<[1], [1], [0], [0], [0, 0, 1, 0], [], []>} : vector<32x8xf32>, vector<32x8xf32>, vector<32x32xf32> -> vector<32x32xf32>
    %c1 = arith.constant 1 : index
    %c0_19 = arith.constant 0 : index
    %c0_20 = arith.constant 0 : index
    %36 = vector.load %arg5[%c1, %c0_19, %c0_20] : memref<4x32x32xf32, #tpu.memory_space<vmem>>, vector<1x32x32xf32>
    %37 = vector.shape_cast %36 : vector<1x32x32xf32> to vector<32x32xf32>
    %38 = arith.addf %35, %37 : vector<32x32xf32>
    %39 = arith.addf %38, %8 : vector<32x32xf32>
    %cst_21 = arith.constant dense<0xFF800000> : vector<32xf32>
    %40 = vector.multi_reduction <maximumf>, %39, %cst_21 [1] : vector<32x32xf32> to vector<32xf32>
    %41 = vector.shape_cast %40 : vector<32xf32> to vector<32x1xf32>
    %42 = vector.broadcast %41 : vector<32x1xf32> to vector<32x32xf32>
    %43 = arith.subf %39, %42 : vector<32x32xf32>
    %44 = math.exp %43 : vector<32x32xf32>
    %cst_22 = arith.constant dense<0.000000e+00> : vector<32xf32>
    %45 = vector.multi_reduction <add>, %44, %cst_22 [1] : vector<32x32xf32> to vector<32xf32>
    %46 = vector.shape_cast %45 : vector<32xf32> to vector<32x1xf32>
    %47 = tpu.reciprocal %46 {approx = true} : vector<32x1xf32> -> vector<32x1xf32>
    %48 = vector.broadcast %47 : vector<32x1xf32> to vector<32x32xf32>
    %49 = arith.mulf %44, %48 : vector<32x32xf32>
    %cst_23 = arith.constant dense<0.000000e+00> : vector<32x8xf32>
    %50 = tpu.matmul %49, %34, %cst_23 {dimension_numbers = #tpu.dot_dimension_numbers<[1], [0], [0], [1], [0, 0, 1, 1], [], []>} : vector<32x32xf32>, vector<32x8xf32>, vector<32x8xf32> -> vector<32x8xf32>
    %51 = vector.extract_strided_slice %6 {offsets = [0, 16], sizes = [32, 8], strides = [1, 1]} : vector<32x96xf32> to vector<32x8xf32>
    %cst_24 = arith.constant 0.353553385 : f32
    %52 = vector.broadcast %cst_24 : f32 to vector<32x8xf32>
    %53 = arith.mulf %51, %52 : vector<32x8xf32>
    %54 = vector.extract_strided_slice %6 {offsets = [0, 48], sizes = [32, 8], strides = [1, 1]} : vector<32x96xf32> to vector<32x8xf32>
    %55 = vector.extract_strided_slice %6 {offsets = [0, 80], sizes = [32, 8], strides = [1, 1]} : vector<32x96xf32> to vector<32x8xf32>
    %cst_25 = arith.constant dense<0.000000e+00> : vector<32x32xf32>
    %56 = tpu.matmul %53, %54, %cst_25 {dimension_numbers = #tpu.dot_dimension_numbers<[1], [1], [0], [0], [0, 0, 1, 0], [], []>} : vector<32x8xf32>, vector<32x8xf32>, vector<32x32xf32> -> vector<32x32xf32>
    %c2 = arith.constant 2 : index
    %c0_26 = arith.constant 0 : index
    %c0_27 = arith.constant 0 : index
    %57 = vector.load %arg5[%c2, %c0_26, %c0_27] : memref<4x32x32xf32, #tpu.memory_space<vmem>>, vector<1x32x32xf32>
    %58 = vector.shape_cast %57 : vector<1x32x32xf32> to vector<32x32xf32>
    %59 = arith.addf %56, %58 : vector<32x32xf32>
    %60 = arith.addf %59, %8 : vector<32x32xf32>
    %cst_28 = arith.constant dense<0xFF800000> : vector<32xf32>
    %61 = vector.multi_reduction <maximumf>, %60, %cst_28 [1] : vector<32x32xf32> to vector<32xf32>
    %62 = vector.shape_cast %61 : vector<32xf32> to vector<32x1xf32>
    %63 = vector.broadcast %62 : vector<32x1xf32> to vector<32x32xf32>
    %64 = arith.subf %60, %63 : vector<32x32xf32>
    %65 = math.exp %64 : vector<32x32xf32>
    %cst_29 = arith.constant dense<0.000000e+00> : vector<32xf32>
    %66 = vector.multi_reduction <add>, %65, %cst_29 [1] : vector<32x32xf32> to vector<32xf32>
    %67 = vector.shape_cast %66 : vector<32xf32> to vector<32x1xf32>
    %68 = tpu.reciprocal %67 {approx = true} : vector<32x1xf32> -> vector<32x1xf32>
    %69 = vector.broadcast %68 : vector<32x1xf32> to vector<32x32xf32>
    %70 = arith.mulf %65, %69 : vector<32x32xf32>
    %cst_30 = arith.constant dense<0.000000e+00> : vector<32x8xf32>
    %71 = tpu.matmul %70, %55, %cst_30 {dimension_numbers = #tpu.dot_dimension_numbers<[1], [0], [0], [1], [0, 0, 1, 1], [], []>} : vector<32x32xf32>, vector<32x8xf32>, vector<32x8xf32> -> vector<32x8xf32>
    %72 = vector.extract_strided_slice %6 {offsets = [0, 24], sizes = [32, 8], strides = [1, 1]} : vector<32x96xf32> to vector<32x8xf32>
    %cst_31 = arith.constant 0.353553385 : f32
    %73 = vector.broadcast %cst_31 : f32 to vector<32x8xf32>
    %74 = arith.mulf %72, %73 : vector<32x8xf32>
    %75 = vector.extract_strided_slice %6 {offsets = [0, 56], sizes = [32, 8], strides = [1, 1]} : vector<32x96xf32> to vector<32x8xf32>
    %76 = vector.extract_strided_slice %6 {offsets = [0, 88], sizes = [32, 8], strides = [1, 1]} : vector<32x96xf32> to vector<32x8xf32>
    %cst_32 = arith.constant dense<0.000000e+00> : vector<32x32xf32>
    %77 = tpu.matmul %74, %75, %cst_32 {dimension_numbers = #tpu.dot_dimension_numbers<[1], [1], [0], [0], [0, 0, 1, 0], [], []>} : vector<32x8xf32>, vector<32x8xf32>, vector<32x32xf32> -> vector<32x32xf32>
    %c3 = arith.constant 3 : index
    %c0_33 = arith.constant 0 : index
    %c0_34 = arith.constant 0 : index
    %78 = vector.load %arg5[%c3, %c0_33, %c0_34] : memref<4x32x32xf32, #tpu.memory_space<vmem>>, vector<1x32x32xf32>
    %79 = vector.shape_cast %78 : vector<1x32x32xf32> to vector<32x32xf32>
    %80 = arith.addf %77, %79 : vector<32x32xf32>
    %81 = arith.addf %80, %8 : vector<32x32xf32>
    %cst_35 = arith.constant dense<0xFF800000> : vector<32xf32>
    %82 = vector.multi_reduction <maximumf>, %81, %cst_35 [1] : vector<32x32xf32> to vector<32xf32>
    %83 = vector.shape_cast %82 : vector<32xf32> to vector<32x1xf32>
    %84 = vector.broadcast %83 : vector<32x1xf32> to vector<32x32xf32>
    %85 = arith.subf %81, %84 : vector<32x32xf32>
    %86 = math.exp %85 : vector<32x32xf32>
    %cst_36 = arith.constant dense<0.000000e+00> : vector<32xf32>
    %87 = vector.multi_reduction <add>, %86, %cst_36 [1] : vector<32x32xf32> to vector<32xf32>
    %88 = vector.shape_cast %87 : vector<32xf32> to vector<32x1xf32>
    %89 = tpu.reciprocal %88 {approx = true} : vector<32x1xf32> -> vector<32x1xf32>
    %90 = vector.broadcast %89 : vector<32x1xf32> to vector<32x32xf32>
    %91 = arith.mulf %86, %90 : vector<32x32xf32>
    %cst_37 = arith.constant dense<0.000000e+00> : vector<32x8xf32>
    %92 = tpu.matmul %91, %76, %cst_37 {dimension_numbers = #tpu.dot_dimension_numbers<[1], [0], [0], [1], [0, 0, 1, 1], [], []>} : vector<32x32xf32>, vector<32x8xf32>, vector<32x8xf32> -> vector<32x8xf32>
    %93 = tpu.concatenate %29, %50, %71, %92 in 1 : vector<32x8xf32>, vector<32x8xf32>, vector<32x8xf32>, vector<32x8xf32> -> vector<32x32xf32>
    %c0_38 = arith.constant 0 : index
    %c0_39 = arith.constant 0 : index
    %94 = vector.load %arg7[%c0_38, %c0_39] : memref<32x32xf32, #tpu.memory_space<vmem>>, vector<32x32xf32>
    %cst_40 = arith.constant dense<0.000000e+00> : vector<32x32xf32>
    %95 = tpu.matmul %93, %94, %cst_40 {dimension_numbers = #tpu.dot_dimension_numbers<[1], [0], [0], [1], [0, 0, 1, 1], [], []>} : vector<32x32xf32>, vector<32x32xf32>, vector<32x32xf32> -> vector<32x32xf32>
    %c0_41 = arith.constant 0 : index
    %c0_42 = arith.constant 0 : index
    %96 = vector.load %arg8[%c0_41, %c0_42] : memref<1x32xf32, #tpu.memory_space<vmem>>, vector<1x32xf32>
    %97 = vector.broadcast %96 : vector<1x32xf32> to vector<32x32xf32>
    %98 = arith.addf %95, %97 : vector<32x32xf32>
    %c0_43 = arith.constant 0 : index
    %c0_44 = arith.constant 0 : index
    %c0_45 = arith.constant 0 : index
    %99 = vector.load %arg9[%c0_43, %c0_44, %c0_45] : memref<1x32x32xf32, #tpu.memory_space<vmem>>, vector<1x32x32xf32>
    %100 = vector.shape_cast %99 : vector<1x32x32xf32> to vector<32x32xf32>
    %101 = vector.shape_cast %98 : vector<32x32xf32> to vector<1x32x32xf32>
    tpu.vector_store %arg9[%c0_43, %c0_44, %c0_45], %101 {strides = array<i32>} : memref<1x32x32xf32, #tpu.memory_space<vmem>>, vector<1x32x32xf32>,
    return
  }
  func.func @transform_0(%arg0: i32, %arg1: i32) -> (i32, i32, i32) {
    %c2_i32 = arith.constant 2 : i32
    %0 = arith.muli %arg0, %c2_i32 : i32
    %1 = arith.addi %0, %arg1 : i32
    %c0_i32 = arith.constant 0 : i32
    %c0_i32_0 = arith.constant 0 : i32
    %c0_i32_1 = arith.constant 0 : i32
    return %1, %c0_i32, %c0_i32_0 : i32, i32, i32
  }
  func.func @transform_1(%arg0: i32, %arg1: i32) -> (i32, i32) {
    %c0_i32 = arith.constant 0 : i32
    %c0_i32_0 = arith.constant 0 : i32
    %c0_i32_1 = arith.constant 0 : i32
    return %c0_i32, %c0_i32_0 : i32, i32
  }
  func.func @transform_2(%arg0: i32, %arg1: i32) -> (i32, i32) {
    %c0_i32 = arith.constant 0 : i32
    %c0_i32_0 = arith.constant 0 : i32
    %c0_i32_1 = arith.constant 0 : i32
    return %c0_i32, %c0_i32_0 : i32, i32
  }
  func.func @transform_3(%arg0: i32, %arg1: i32) -> (i32, i32, i32) {
    %c0_i32 = arith.constant 0 : i32
    %c0_i32_0 = arith.constant 0 : i32
    %c0_i32_1 = arith.constant 0 : i32
    %c0_i32_2 = arith.constant 0 : i32
    return %c0_i32, %c0_i32_0, %c0_i32_1 : i32, i32, i32
  }
  func.func @transform_4(%arg0: i32, %arg1: i32) -> (i32, i32, i32) {
    %c0_i32 = arith.constant 0 : i32
    %c0_i32_0 = arith.constant 0 : i32
    %c0_i32_1 = arith.constant 0 : i32
    return %arg1, %c0_i32, %c0_i32_0 : i32, i32, i32
  }
  func.func @transform_5(%arg0: i32, %arg1: i32) -> (i32, i32) {
    %c0_i32 = arith.constant 0 : i32
    %c0_i32_0 = arith.constant 0 : i32
    %c0_i32_1 = arith.constant 0 : i32
    return %c0_i32, %c0_i32_0 : i32, i32
  }
  func.func @transform_6(%arg0: i32, %arg1: i32) -> (i32, i32) {
    %c0_i32 = arith.constant 0 : i32
    %c0_i32_0 = arith.constant 0 : i32
    %c0_i32_1 = arith.constant 0 : i32
    return %c0_i32, %c0_i32_0 : i32, i32
  }
  func.func @transform_7(%arg0: i32, %arg1: i32) -> (i32, i32, i32) {
    %c2_i32 = arith.constant 2 : i32
    %0 = arith.muli %arg0, %c2_i32 : i32
    %1 = arith.addi %0, %arg1 : i32
    %c0_i32 = arith.constant 0 : i32
    %c0_i32_0 = arith.constant 0 : i32
    %c0_i32_1 = arith.constant 0 : i32
    return %1, %c0_i32, %c0_i32_0 : i32, i32, i32
  }
}

</mosaic_0001>

<bundles_post_ra>
// kernel: window_attention3d_pallas.1
= control target key start
LH: loop header
LB: loop body
LE: loop exit
PB: predicated region body
PF: predicated region fallthrough
CT: control target
= control target key end

     0   :  { %12 = vsyncpa [#allocation3], 0  ;;  %s2931_s0 = inlined_call_operand.vmem [shape: f32[4,32,32], index: 0, kind: input, shape index: {}]   ;;  %s2932_s1 = inlined_call_operand.vmem [shape: f32[32,96], index: 1, kind: input, shape index: {}]   ;;  %s2933_s2 = inlined_call_operand.vmem [shape: f32[1,96], index: 2, kind: input, shape index: {}]   ;;  %s2934_s3 = inlined_call_operand.vmem [shape: f32[4,32,32], index: 3, kind: input, shape index: {}]   ;;  %s2935_s4 = inlined_call_operand.vmem [shape: f32[2,32,32], index: 4, kind: input, shape index: {}]   ;;  %s2936_s5 = inlined_call_operand.vmem [shape: f32[32,32], index: 5, kind: input, shape index: {}]   ;;  %s2937_s6 = inlined_call_operand.vmem [shape: f32[1,32], index: 6, kind: input, shape index: {}]   ;;  %s2938_s7 = inlined_call_operand.hbm [shape: f32[4,32,32], index: 7, kind: output, shape index: {}]  }
   0x1   :  { %14 = vsyncpa [#allocation3 + $0x1], 0  ;;  %s2457_s24 = smov 0   ;;  %s2459_s25 = smov 0  }
   0x2   :  { %s2461_s26 = smov 0   ;;  %s2463_s27 = smov 0  }
   0x3   :  { %s2465_s28 = smov 0   ;;  %s2467_s29 = smov 0  }
   0x4   :  { %s2469_s30 = smov 0   ;;  %s2471_s8 = smov 0  }
   0x5 LB: > { %s1843_s9 = sadd.s32 4294967295, %s2399_s8   ;;  %s29_s10 = sadd.s32 1, %s2391_s29  ;;  %s2399_s8 = sphi %s2471_s8, %s20_s8   ;;  %s2395_s30 = sphi %s2469_s30, %s2949_s30   ;;  %s2391_s29 = sphi %s2467_s29, %s2948_s29   ;;  %s2387_s28 = sphi %s2465_s28, %s2947_s28   ;;  %s2383_s27 = sphi %s2463_s27, %s2946_s27   ;;  %s2379_s26 = sphi %s2461_s26, %s2945_s26   ;;  %s2375_s25 = sphi %s2459_s25, %s2944_s25   ;;  %s2371_s24 = sphi %s2457_s24, %s2943_s24  }
   0x6   : > { %s32_s11 = sadd.s32 1, %s2395_s30  ;;  %p30_p0 = scmp.ge.s32.totalorder %s29_s10, 2 }
   0x7   : > { %s1847_s12 = sshll.u32 %s2395_s30, 1  ;;  %s1844_s13 = sadd.s32 4294967294, %s2399_s8  }
   0x8   : > { %s198_s14 = sadd.s32 %s2391_s29, %s1847_s12  ;;  %s2951_s10 = smov (%p30_p0, %s29_s10), 0 }
   0x9   : > { %s2953_s11 = smov (!%p30_p0, %s32_s11), %s2395_s30  ;;  %p214_p1 = scmp.ne.s32.totalorder %s2379_s26, %s2375_s25 }
   0xa   : > { %p215_p2 = scmp.eq.s32.totalorder %s1843_s9, 3  ;;  %p34_p3 = scmp.ge.s32.totalorder %s2953_s11, 2 }
   0xb   : > { %p220_p4 = scmp.ne.s32.totalorder %s2375_s25, %s2371_s24  ;;  %p221_p6 = scmp.eq.s32.totalorder %s1844_s13, 3 }
   0xc   : > { %p2510_p5 = por %p215_p2, %p214_p1  ;;  %s2955_s11 = smov (%p34_p3, %s2953_s11), 0 }
   0xd   : > { %p2516_p7 = por %p221_p6, %p220_p4  ;;  %p1851_p8 = scmp.ge.s32.totalorder %s2399_s8, 1 }
   0xe   : > { %s1848_s17 = sshll.u32 %s2955_s11, 1  ;;  %p274_p9 = scmp.lt.s32.totalorder %s2399_s8, 5 }
   0xf   : > { %s200_s18 = sadd.s32 %s1848_s17, %s2951_s10  ;;  %s204_s19 = sadd.s32 1, %s2379_s26 }
  0x10   : > { %s201_s20 = ssub.s32 %s198_s14, %s200_s18  ;;  %p275_p10 = pnand %p1851_p8, %p274_p9 }
  0x11   : > { %p202_p11 = scmp.eq.s32.totalorder %s201_s20, 0  ;;  %s1853_s13 = sshll.u32 (!%p275_p10), %s2387_s28, 1 }
  0x12   : > { %278 = sbr.rel (%p275_p10) target bundleno = 3157 (0xc55), region = 48  ;;  %s2536_s17 = sadd.s32 (!%p275_p10), %s2383_s27, %s1853_s13 }
  0x13   : > { %s2526_s21 = scalar_select %p202_p11, %s2379_s26, %s204_s19  }
  0x14   : > { %p315_p12 = scmp.lt.s32.totalorder (!%p275_p10), %s2536_s17, 3  ;;  %s2401_s18 = smov (!%p275_p10), 96  }
  0x15   : > { %s2402_s19 = smov (!%p275_p10), 64   ;;  %p322_p13 = scmp.lt.s32.totalorder (!%p275_p10), %s2383_s27, 1 }
  0x16   : > { %s1936_s14 = sshll.u32 (!%p275_p10), %s2536_s17, 9  ;;  %s2415_s9 = smov (!%p275_p10), [#allocation2]  }
  0x17   : > { %v336_v0 = vld [vmem:[%s2932_s1 + $0x18] sm:$0xff]  ;;  %v335_v1 = vld [vmem:[%s2932_s1 + $0x10] sm:$0xff]  ;;  %v334_v2 = vld [vmem:[%s2932_s1 + $0x8] sm:$0xff]  ;;  %s316_s22 = scalar_select %p315_p12, %s2536_s17, 3  ;;  %vm344_vm0 = vcmask 261120   ;;  %vm466_vm1 = vcmask 64512  }
  0x18   : > { %2017 = vmatprep.subr.mxu0 %v336_v0  ;;  %v333_v3 = vld [vmem:[%s2932_s1] sm:$0xff]  ;;  %s2957_s27 = smov (!%p322_p13, %s2383_s27), 1  ;;  %v451_v29 = vld [vmem:[%s2934_s3 + $0x8] sm:$0xff]  ;;  %v453_v35 = vld [vmem:[%s2934_s3 + $0x18] sm:$0xff]  ;;  %vm1618_vm2 = vcmask 130048   ;;  %vm1623_vm3 = vcmask 195584  }
  0x19   : > { %2018 = vmatpush3.msra.mxu0 %v336_v0  ;;  %s1934_s28 = sshll.u32 %s316_s22, 5  ;;  %v1858_v8 = vld [vmem:[%s2933_s2] ss:$0 sm:$0xff]  ;;  %s1935_s20 = sshll.u32 %s2957_s27, 5  ;;  %v452_v40 = vld [vmem:[%s2934_s3 + $0x10] sm:$0xff] }
  0x1a   : > { %2019 = vmatprep.subr.mxu0 %v335_v1  ;;  %s319_s12 = scalar_lea.vmem %s2931_s0, %s1934_s28  ;;  %s326_s23 = scalar_lea.vmem %s2935_s4, %s1935_s20  ;;  %v450_v31 = vld [vmem:[%s2934_s3] sm:$0xff] }
  0x1b   : > { %2020 = vmatpush3.msra.mxu0 %v335_v1  ;;  %v329_v4 = vld [vmem:[%s319_s12] sm:$0xff]  ;;  %v330_v5 = vld [vmem:[%s319_s12 + $0x8] sm:$0xff]  ;;  %v331_v6 = vld [vmem:[%s319_s12 + $0x10] sm:$0xff]  ;;  %s2403_s22 = smov 88   ;;  %s2404_s28 = smov 120  }
  0x1c   : > { %2021 = vmatprep.subr.mxu0 %v334_v2  ;;  %2025 = vmatprep.mubr.msk.f32.mxu0 %vm344_vm0, %v329_v4  ;;  %v332_v7 = vld [vmem:[%s319_s12 + $0x18] sm:$0xff]  ;;  %v2611_v32 = vld [vmem:[%s326_s23 + $0x8] sm:$0xff]  ;;  %v2616_v36 = vld [vmem:[%s326_s23] sm:$0xff]  ;;  %s2411_s20 = smov 40   ;;  %s2311_s12 = sshll.u32 %s2415_s9, 4  ;;  %s2312_s12 = int_to_ptr.vmem [resolvable:$false] %s2311_s12 }
  0x1d   : > { %2022 = vmatpush3.msra.mxu0 %v334_v2  ;;  %v2622_v41 = vld [vmem:[%s326_s23 + $0x18] sm:$0xff]  ;;  %v2628_v49 = vld [vmem:[%s326_s23 + $0x10] sm:$0xff]  ;;  %s2405_s23 = smov 56  }
  0x1e   : > { %2023 = vmatprep.subr.mxu0 %v333_v3 }
  0x1f   : > { %2024 = vmatpush3.msra.mxu0 %v333_v3 }
  0x20   : > { %2026 = vmatmul.mubr.msk.f32.vlgmr.msra.gmra.mxu0 %vm344_vm0, %v330_v5 }
  0x21   : > { %2028 = vmatprep.mubr.msk.f32.mxu0 %vm344_vm0, %v331_v6 }
  0x24   : > { %2029 = vmatmul.mubr.msk.f32.gmra.mxu0 %vm344_vm0, %v332_v7 }
  0xe0   : > { %v2027_v9 = vpop.f32.mrf.mxu0 }
  0xe1   : > { %v2556_v10 = vadd.f32 %v2027_v9, %v1858_v8 }
  0xe2   : > { %v423_v11 = vpop.f32.mrf.mxu0 }
  0xe3   : > { %v2558_v12 = vadd.f32 %v1858_v8, %v423_v11  ;;  %460 = vrot.lane.b32.xlu1 %v2556_v10, %s2401_s18  ;;  %v2586_v26 = vmul.f32 0.35355338, %v2556_v10 }
  0xe4   : > { %v2030_v13 = vpop.f32.mrf.mxu0 }
  0xe5   : > { %v2561_v14 = vadd.f32 %v2030_v13, %v1858_v8  ;;  %v2564_v15 = vmul.f32 0.35355338, %v2558_v12 }
  0xe6   : > { %v433_v16 = vpop.f32.mrf.mxu0 }
  0xe7   : > { %464 = vrot.lane.b32.xlu0 %v2561_v14, %s2401_s18  ;;  %458 = vrot.lane.b32.xlu1 %v2558_v12, %s2401_s18  ;;  %v2570_v17 = vadd.f32 %v1858_v8, %v433_v16  ;;  %v2596_v28 = vmul.f32 0.35355338, %v2561_v14 }
  0xe8   : > { %2039 = vmatprep.mubr.msk.f32.mxu1 %vm466_vm1, %v2564_v15 }
  0xe9   : > { %v2589_v27 = vmul.f32 0.35355338, %v2570_v17 }
  0xeb   : > { %462 = vrot.lane.b32.xlu0 %v2570_v17, %s2401_s18  ;;  %626 = vrot.lane.b32.xlu1 %v2561_v14, %s2402_s19 }
  0xef   : > { %624 = vrot.lane.b32.xlu0 %v2570_v17, %s2402_s19  ;;  %622 = vrot.lane.b32.xlu1 %v2556_v10, %s2402_s19 }
  0xf3   : > { %620 = vrot.lane.b32.xlu1 %v2558_v12, %s2402_s19 }
 0x155   : > { %v461_v18 = vpop.permute.xlu1 %460 }
 0x159   : > { %v465_v19 = vpop.permute.xlu0 %464  ;;  %v459_v20 = vpop.permute.xlu1 %458 }
 0x15a   : > { %2031 = vmatprep.subr.msk.mxu1 %vm466_vm1, %v465_v19 }
 0x15b   : > { %2032 = vmatpush3.xpose.msk.msra.mxu1 %vm466_vm1, %v465_v19 }
 0x15d   : > { %v463_v21 = vpop.permute.xlu0 %462  ;;  %v627_v22 = vpop.permute.xlu1 %626 }
 0x15e   : > { %2033 = vmatprep.subr.msk.mxu1 %vm466_vm1, %v463_v21  ;;  %2045 = vmatprep.subr.mxu0 %v627_v22 }
 0x15f   : > { %2034 = vmatpush3.xpose.msk.msra.mxu1 %vm466_vm1, %v463_v21  ;;  %2046 = vmatpush3.msra.mxu0 %v627_v22 }
 0x160   : > { %2035 = vmatprep.subr.msk.mxu1 %vm466_vm1, %v461_v18 }
 0x161   : > { %v625_v23 = vpop.permute.xlu0 %624  ;;  %v623_v24 = vpop.permute.xlu1 %622 }
 0x162   : > { %2047 = vmatprep.subr.mxu0 %v625_v23 }
 0x163   : > { %2036 = vmatpush3.xpose.msk.msra.mxu1 %vm466_vm1, %v461_v18  ;;  %2048 = vmatpush3.msra.mxu0 %v625_v23 }
 0x164   : > { %2037 = vmatprep.subr.msk.mxu1 %vm466_vm1, %v459_v20  ;;  %2049 = vmatprep.subr.mxu0 %v623_v24 }
 0x165   : > { %2050 = vmatpush3.msra.mxu0 %v623_v24  ;;  %v621_v25 = vpop.permute.xlu1 %620 }
 0x166   : > { %2051 = vmatprep.subr.mxu0 %v621_v25 }
 0x167   : > { %2038 = vmatpush3.xpose.msk.msra.mxu1 %vm466_vm1, %v459_v20  ;;  %2052 = vmatpush3.msra.mxu0 %v621_v25 }
 0x16a   : > { %2040 = vmatmul.mubr.msk.f32.vlgmr.msra.gmra.mxu1 %vm466_vm1, %v2586_v26 }
 0x16b   : > { %2042 = vmatprep.mubr.msk.f32.mxu1 %vm466_vm1, %v2589_v27 }
 0x16e   : > { %2043 = vmatmul.mubr.msk.f32.gmra.mxu1 %vm466_vm1, %v2596_v28 }
 0x22a   : > { %v2041_v30 = vpop.f32.mrf.mxu1 }
 0x22b   : > { %v559_v33 = vadd.f32 %v2041_v30, %v451_v29 }
 0x22c   : > { %v553_v34 = vpop.f32.mrf.mxu1 }
 0x22d   : > { %v554_v37 = vadd.f32 %v553_v34, %v450_v31  ;;  %v573_v38 = vadd.f32 %v559_v33, %v2611_v32 }
 0x22e   : > { %v2044_v39 = vpop.f32.mrf.mxu1 }
 0x22f   : > { %v569_v42 = vadd.f32 %v2044_v39, %v453_v35  ;;  %v579_v43 = vsel %vm344_vm0, %v573_v38, -inf  ;;  %v572_v44 = vadd.f32 %v554_v37, %v2616_v36 }
 0x230   : > { %580 = vmax.xlane.f32.xlu1 %v579_v43  ;;  %v563_v45 = vpop.f32.mrf.mxu1 }
 0x231   : > { %v564_v46 = vadd.f32 %v563_v45, %v452_v40  ;;  %v576_v47 = vsel %vm344_vm0, %v572_v44, -inf  ;;  %v575_v48 = vadd.f32 %v569_v42, %v2622_v41 }
 0x232   : > { %577 = vmax.xlane.f32.xlu0 %v576_v47 }
 0x233   : > { %v585_v50 = vsel %vm344_vm0, %v575_v48, -inf  ;;  %v574_v51 = vadd.f32 %v564_v46, %v2628_v49 }
 0x235   : > { %v582_v52 = vsel %vm344_vm0, %v574_v51, -inf }
 0x236   : > { %586 = vmax.xlane.f32.xlu0 %v585_v50 }
 0x23a   : > { %583 = vmax.xlane.f32.xlu0 %v582_v52 }
 0x241   : > { %746 = vrot.lane.b32.xlu1 %v2570_v17, %s2403_s22 }
 0x250   : > { %748 = vrot.lane.b32.xlu0 %v2561_v14, %s2403_s22 }
 0x2b9   : > { %v581_v53 = vpop.xlane.xlu1 %580 }
 0x2ba   : > { %v589_v54 = vsub.f32 %v573_v38, %v581_v53 }
 0x2bb   : > { %v578_v55 = vpop.xlane.xlu0 %577 }
 0x2bc   : > { %v594_v56 = vmul.f32 1.442695, %v589_v54  ;;  %v588_v57 = vsub.f32 %v572_v44, %v578_v55  ;;  %v1878_v54 = vld [vmem:[%s2934_s3 + $0x38] sm:$0xff] }
 0x2bd   : > { %v747_v11 = vpop.permute.xlu1 %746 }
 0x2be   : > { %2243 = vpow2.f32 %v594_v56  ;;  %v592_v58 = vmul.f32 1.442695, %v588_v57 }
 0x2bf   : > { %v587_v59 = vpop.xlane.xlu0 %586 }
 0x2c0   : > { %2245 = vpow2.f32 %v592_v58  ;;  %v591_v2 = vsub.f32 %v575_v48, %v587_v59  ;;  %v1876_v48 = vld [vmem:[%s2934_s3 + $0x28] sm:$0xff]  ;;  %v1877_v58 = vld [vmem:[%s2934_s3 + $0x30] sm:$0xff] }
 0x2c2   : > { %v598_v4 = vmul.f32 1.442695, %v591_v2 }
 0x2c3   : > { %v584_v60 = vpop.xlane.xlu0 %583 }
 0x2c4   : > { %v590_v3 = vsub.f32 %v574_v51, %v584_v60  ;;  %2247 = vpow2.f32 %v598_v4  ;;  %v1875_v51 = vld [vmem:[%s2934_s3 + $0x20] sm:$0xff] }
 0x2c6   : > { %v596_v5 = vmul.f32 1.442695, %v590_v3 }
 0x2c7   : > { %v749_v61 = vpop.permute.xlu0 %748 }
 0x2c8   : > { %2059 = vmatprep.subr.msk.mxu0 %vm466_vm1, %v749_v61  ;;  %2249 = vpow2.f32 %v596_v5 }
 0x2cb   : > { %v2244_v62 = vpop.eup %2243 }
 0x2cc   : > { %v603_v63 = vsel %vm344_vm0, %v2244_v62, 0.0 }
 0x2cd   : > { %v2246_v0 = vpop.eup %2245  ;;  %604 = vadd.xlane.f32.xlu0 %v603_v63 }
 0x2ce   : > { %v600_v1 = vsel %vm344_vm0, %v2246_v0, 0.0 }
 0x2cf   : > { %601 = vadd.xlane.f32.xlu1 %v600_v1 }
 0x2d1   : > { %v2248_v6 = vpop.eup %2247 }
 0x2d2   : > { %v609_v8 = vsel %vm344_vm0, %v2248_v6, 0.0 }
 0x2d5   : > { %v2250_v7 = vpop.eup %2249 }
 0x2d6   : > { %v606_v9 = vsel %vm344_vm0, %v2250_v7, 0.0 }
 0x2e0   : > { %742 = vrot.lane.b32.xlu1 %v2558_v12, %s2403_s22 }
 0x2e3   : > { %744 = vrot.lane.b32.xlu0 %v2556_v10, %s2403_s22  ;;  %s2406_s22 = smov 80  }
 0x302   : > { %610 = vadd.xlane.f32.xlu0 %v609_v8 }
 0x304   : > { %607 = vadd.xlane.f32.xlu1 %v606_v9 }
 0x315   : > { %736 = vrot.lane.b32.xlu1 %v2586_v26, %s2404_s28 }
 0x318   : > { %734 = vrot.lane.b32.xlu0 %v2564_v15, %s2404_s28 }
 0x319   : > { %740 = vrot.lane.b32.xlu1 %v2596_v28, %s2404_s28 }
 0x31c   : > { %738 = vrot.lane.b32.xlu0 %v2589_v27, %s2404_s28  ;;  %s2407_s28 = smov 112  }
 0x31d   : > { %905 = vrot.lane.b32.xlu1 %v2561_v14, %s2405_s23 }
 0x320   : > { %903 = vrot.lane.b32.xlu0 %v2570_v17, %s2405_s23 }
 0x321   : > { %901 = vrot.lane.b32.xlu1 %v2556_v10, %s2405_s23 }
 0x325   : > { %899 = vrot.lane.b32.xlu1 %v2558_v12, %s2405_s23  ;;  %s2408_s23 = smov 48  }
 0x356   : > { %v605_v13 = vpop.xlane.xlu0 %604 }
 0x357   : > { %2251 = vrcp.f32 %v605_v13 }
 0x358   : > { %v602_v16 = vpop.xlane.xlu1 %601 }
 0x359   : > { %2253 = vrcp.f32 %v602_v16 }
 0x35a   : > { %v745_v22 = vpop.permute.xlu0 %744 }
 0x35c   : > { %v743_v23 = vpop.permute.xlu1 %742 }
 0x364   : > { %v2252_v18 = vpop.eup %2251 }
 0x365   : > { %v617_v21 = vmul.f32 %v2252_v18, %v2244_v62 }
 0x366   : > { %v2254_v19 = vpop.eup %2253 }
 0x367   : > { %v616_v20 = vmul.f32 %v2254_v19, %v2246_v0 }
 0x369   : > { %2053 = vmatprep.mubr.msk.f32.mxu0 %vm344_vm0, %v616_v20 }
 0x36a   : > { %2054 = vmatmul.mubr.msk.f32.vlgmr.msra.gmra.mxu0 %vm344_vm0, %v617_v21 }
 0x36b   : > { %2060 = vmatpush3.xpose.msk.msra.mxu0 %vm466_vm1, %v749_v61 }
 0x36c   : > { %2061 = vmatprep.subr.msk.mxu0 %vm466_vm1, %v747_v11 }
 0x36f   : > { %2062 = vmatpush3.xpose.msk.msra.mxu0 %vm466_vm1, %v747_v11 }
 0x370   : > { %2063 = vmatprep.subr.msk.mxu0 %vm466_vm1, %v745_v22 }
 0x373   : > { %2064 = vmatpush3.xpose.msk.msra.mxu0 %vm466_vm1, %v745_v22 }
 0x374   : > { %2065 = vmatprep.subr.msk.mxu0 %vm466_vm1, %v743_v23 }
 0x377   : > { %2066 = vmatpush3.xpose.msk.msra.mxu0 %vm466_vm1, %v743_v23 }
 0x38b   : > { %v611_v24 = vpop.xlane.xlu0 %610 }
 0x38c   : > { %2255 = vrcp.f32 %v611_v24 }
 0x38d   : > { %v608_v25 = vpop.xlane.xlu1 %607 }
 0x38e   : > { %2257 = vrcp.f32 %v608_v25 }
 0x38f   : > { %v735_v29 = vpop.permute.xlu0 %734 }
 0x391   : > { %v737_v30 = vpop.permute.xlu1 %736 }
 0x393   : > { %v739_v31 = vpop.permute.xlu0 %738 }
 0x395   : > { %v741_v33 = vpop.permute.xlu1 %740 }
 0x397   : > { %v904_v38 = vpop.permute.xlu0 %903 }
 0x399   : > { %v906_v34 = vpop.permute.xlu1 %905  ;;  %v2256_v35 = vpop.eup %2255 }
 0x39a   : > { %2073 = vmatprep.subr.mxu1 %v906_v34  ;;  %v619_v42 = vmul.f32 %v2256_v35, %v2248_v6 }
 0x39b   : > { %v2258_v37 = vpop.eup %2257  ;;  %2074 = vmatpush3.msra.mxu1 %v906_v34 }
 0x39c   : > { %2075 = vmatprep.subr.mxu1 %v904_v38  ;;  %v618_v39 = vmul.f32 %v2258_v37, %v2250_v7 }
 0x39d   : > { %v902_v40 = vpop.permute.xlu1 %901  ;;  %2076 = vmatpush3.msra.mxu1 %v904_v38 }
 0x39e   : > { %2056 = vmatprep.mubr.msk.f32.mxu0 %vm344_vm0, %v618_v39  ;;  %2077 = vmatprep.subr.mxu1 %v902_v40 }
 0x39f   : > { %2057 = vmatmul.mubr.msk.f32.gmra.mxu0 %vm344_vm0, %v619_v42  ;;  %2078 = vmatpush3.msra.mxu1 %v902_v40 }
 0x3a0   : > { %2067 = vmatprep.mubr.msk.f32.mxu0 %vm466_vm1, %v735_v29 }
 0x3a1   : > { %v900_v43 = vpop.permute.xlu1 %899 }
 0x3a2   : > { %2079 = vmatprep.subr.mxu1 %v900_v43 }
 0x3a3   : > { %2068 = vmatmul.mubr.msk.f32.vlgmr.msra.gmra.mxu0 %vm466_vm1, %v737_v30  ;;  %2080 = vmatpush3.msra.mxu1 %v900_v43 }
 0x3a4   : > { %2070 = vmatprep.mubr.msk.f32.mxu0 %vm466_vm1, %v739_v31 }
 0x3a7   : > { %2071 = vmatmul.mubr.msk.f32.gmra.mxu0 %vm466_vm1, %v741_v33 }
 0x42a   : > { %v2665_v44 = vpop.f32.mrf.mxu0 }
 0x42c   : > { %v2667_v45 = vpop.f32.mrf.mxu0 }
 0x45f   : > { %v2669_v46 = vpop.f32.mrf.mxu0 }
 0x461   : > { %v2671_v47 = vpop.f32.mrf.mxu0 }
 0x463   : > { %v2069_v50 = vpop.f32.mrf.mxu0 }
 0x464   : > { %v838_v52 = vadd.f32 %v2069_v50, %v1876_v48 }
 0x465   : > { %v832_v53 = vpop.f32.mrf.mxu0 }
 0x466   : > { %v833_v55 = vadd.f32 %v1875_v51, %v832_v53  ;;  %v852_v56 = vadd.f32 %v838_v52, %v2611_v32 }
 0x467   : > { %v2072_v57 = vpop.f32.mrf.mxu0 }
 0x468   : > { %v848_v59 = vadd.f32 %v2072_v57, %v1878_v54  ;;  %v858_v60 = vsel %vm344_vm0, %v852_v56, -inf  ;;  %v851_v61 = vadd.f32 %v833_v55, %v2616_v36 }
 0x469   : > { %859 = vmax.xlane.f32.xlu1 %v858_v60  ;;  %v842_v62 = vpop.f32.mrf.mxu0 }
 0x46a   : > { %v843_v63 = vadd.f32 %v1877_v58, %v842_v62  ;;  %v855_v0 = vsel %vm344_vm0, %v851_v61, -inf  ;;  %v854_v1 = vadd.f32 %v848_v59, %v2622_v41 }
 0x46b   : > { %856 = vmax.xlane.f32.xlu0 %v855_v0 }
 0x46c   : > { %v864_v2 = vsel %vm344_vm0, %v854_v1, -inf  ;;  %v853_v3 = vadd.f32 %v843_v63, %v2628_v49 }
 0x46e   : > { %v861_v4 = vsel %vm344_vm0, %v853_v3, -inf }
 0x46f   : > { %865 = vmax.xlane.f32.xlu0 %v864_v2 }
 0x473   : > { %862 = vmax.xlane.f32.xlu0 %v861_v4 }
 0x47a   : > { %1025 = vrot.lane.b32.xlu1 %v2570_v17, %s2406_s22 }
 0x489   : > { %1027 = vrot.lane.b32.xlu0 %v2561_v14, %s2406_s22 }
 0x4f2   : > { %v860_v5 = vpop.xlane.xlu1 %859 }
 0x4f3   : > { %v868_v6 = vsub.f32 %v852_v56, %v860_v5  ;;  %v1892_v5 = vld [vmem:[%s2934_s3 + $0x48] sm:$0xff] }
 0x4f4   : > { %v857_v7 = vpop.xlane.xlu0 %856 }
 0x4f5   : > { %v873_v8 = vmul.f32 1.442695, %v868_v6  ;;  %v867_v9 = vsub.f32 %v851_v61, %v857_v7  ;;  %v1891_v7 = vld [vmem:[%s2934_s3 + $0x40] sm:$0xff] }
 0x4f6   : > { %v1026_v35 = vpop.permute.xlu1 %1025 }
 0x4f7   : > { %2259 = vpow2.f32 %v873_v8  ;;  %v871_v11 = vmul.f32 1.442695, %v867_v9 }
 0x4f8   : > { %v866_v13 = vpop.xlane.xlu0 %865 }
 0x4f9   : > { %2261 = vpow2.f32 %v871_v11  ;;  %v870_v23 = vsub.f32 %v854_v1, %v866_v13  ;;  %v1894_v11 = vld [vmem:[%s2934_s3 + $0x58] sm:$0xff] }
 0x4fb   : > { %v877_v25 = vmul.f32 1.442695, %v870_v23 }
 0x4fc   : > { %v863_v16 = vpop.xlane.xlu0 %862 }
 0x4fd   : > { %v869_v24 = vsub.f32 %v853_v3, %v863_v16  ;;  %2263 = vpow2.f32 %v877_v25 }
 0x4ff   : > { %v875_v29 = vmul.f32 1.442695, %v869_v24 }
 0x500   : > { %v1028_v18 = vpop.permute.xlu0 %1027 }
 0x501   : > { %2087 = vmatprep.subr.msk.mxu1 %vm466_vm1, %v1028_v18  ;;  %2265 = vpow2.f32 %v875_v29 }
 0x504   : > { %v2260_v19 = vpop.eup %2259 }
 0x505   : > { %v882_v20 = vsel %vm344_vm0, %v2260_v19, 0.0 }
 0x506   : > { %v2262_v21 = vpop.eup %2261  ;;  %883 = vadd.xlane.f32.xlu0 %v882_v20 }
 0x507   : > { %v879_v22 = vsel %vm344_vm0, %v2262_v21, 0.0 }
 0x508   : > { %880 = vadd.xlane.f32.xlu1 %v879_v22 }
 0x50a   : > { %v2264_v30 = vpop.eup %2263 }
 0x50b   : > { %v888_v33 = vsel %vm344_vm0, %v2264_v30, 0.0 }
 0x50e   : > { %v2266_v31 = vpop.eup %2265 }
 0x50f   : > { %v885_v34 = vsel %vm344_vm0, %v2266_v31, 0.0 }
 0x519   : > { %1021 = vrot.lane.b32.xlu1 %v2558_v12, %s2406_s22 }
 0x51c   : > { %1023 = vrot.lane.b32.xlu0 %v2556_v10, %s2406_s22  ;;  %s2409_s22 = smov 72  }
 0x53b   : > { %889 = vadd.xlane.f32.xlu0 %v888_v33 }
 0x53d   : > { %886 = vadd.xlane.f32.xlu1 %v885_v34 }
 0x54e   : > { %1015 = vrot.lane.b32.xlu1 %v2586_v26, %s2407_s28 }
 0x551   : > { %1013 = vrot.lane.b32.xlu0 %v2564_v15, %s2407_s28 }
 0x552   : > { %1019 = vrot.lane.b32.xlu1 %v2596_v28, %s2407_s28 }
 0x555   : > { %1017 = vrot.lane.b32.xlu0 %v2589_v27, %s2407_s28  ;;  %s2410_s28 = smov 104  }
 0x556   : > { %1184 = vrot.lane.b32.xlu1 %v2561_v14, %s2408_s23 }
 0x559   : > { %1182 = vrot.lane.b32.xlu0 %v2570_v17, %s2408_s23 }
 0x55a   : > { %1180 = vrot.lane.b32.xlu1 %v2556_v10, %s2408_s23 }
 0x55e   : > { %1178 = vrot.lane.b32.xlu1 %v2558_v12, %s2408_s23 }
 0x58f   : > { %v884_v37 = vpop.xlane.xlu0 %883 }
 0x590   : > { %2267 = vrcp.f32 %v884_v37 }
 0x591   : > { %v881_v38 = vpop.xlane.xlu1 %880 }
 0x592   : > { %2269 = vrcp.f32 %v881_v38 }
 0x593   : > { %v1024_v48 = vpop.permute.xlu0 %1023 }
 0x595   : > { %v1022_v50 = vpop.permute.xlu1 %1021 }
 0x59d   : > { %v2268_v39 = vpop.eup %2267 }
 0x59e   : > { %v896_v43 = vmul.f32 %v2268_v39, %v2260_v19  ;;  %v1893_v19 = vld [vmem:[%s2934_s3 + $0x50] sm:$0xff] }
 0x59f   : > { %v2270_v40 = vpop.eup %2269 }
 0x5a0   : > { %v895_v42 = vmul.f32 %v2270_v40, %v2262_v21 }
 0x5a2   : > { %2081 = vmatprep.mubr.msk.f32.mxu1 %vm344_vm0, %v895_v42 }
 0x5a3   : > { %2082 = vmatmul.mubr.msk.f32.vlgmr.msra.gmra.mxu1 %vm344_vm0, %v896_v43 }
 0x5a4   : > { %2088 = vmatpush3.xpose.msk.msra.mxu1 %vm466_vm1, %v1028_v18 }
 0x5a5   : > { %2089 = vmatprep.subr.msk.mxu1 %vm466_vm1, %v1026_v35 }
 0x5a8   : > { %2090 = vmatpush3.xpose.msk.msra.mxu1 %vm466_vm1, %v1026_v35 }
 0x5a9   : > { %2091 = vmatprep.subr.msk.mxu1 %vm466_vm1, %v1024_v48 }
 0x5ac   : > { %2092 = vmatpush3.xpose.msk.msra.mxu1 %vm466_vm1, %v1024_v48 }
 0x5ad   : > { %2093 = vmatprep.subr.msk.mxu1 %vm466_vm1, %v1022_v50 }
 0x5b0   : > { %2094 = vmatpush3.xpose.msk.msra.mxu1 %vm466_vm1, %v1022_v50 }
 0x5c4   : > { %v890_v51 = vpop.xlane.xlu0 %889 }
 0x5c5   : > { %2271 = vrcp.f32 %v890_v51 }
 0x5c6   : > { %v887_v52 = vpop.xlane.xlu1 %886 }
 0x5c7   : > { %2273 = vrcp.f32 %v887_v52 }
 0x5c8   : > { %v1014_v53 = vpop.permute.xlu0 %1013 }
 0x5ca   : > { %v1016_v54 = vpop.permute.xlu1 %1015 }
 0x5cc   : > { %v1018_v55 = vpop.permute.xlu0 %1017 }
 0x5ce   : > { %v1020_v56 = vpop.permute.xlu1 %1019 }
 0x5d0   : > { %v1183_v60 = vpop.permute.xlu0 %1182 }
 0x5d2   : > { %v1185_v57 = vpop.permute.xlu1 %1184  ;;  %v2272_v58 = vpop.eup %2271 }
 0x5d3   : > { %2101 = vmatprep.subr.mxu0 %v1185_v57  ;;  %v898_v63 = vmul.f32 %v2272_v58, %v2264_v30 }
 0x5d4   : > { %v2274_v59 = vpop.eup %2273  ;;  %2102 = vmatpush3.msra.mxu0 %v1185_v57 }
 0x5d5   : > { %2103 = vmatprep.subr.mxu0 %v1183_v60  ;;  %v897_v61 = vmul.f32 %v2274_v59, %v2266_v31 }
 0x5d6   : > { %v1181_v62 = vpop.permute.xlu1 %1180  ;;  %2104 = vmatpush3.msra.mxu0 %v1183_v60 }
 0x5d7   : > { %2084 = vmatprep.mubr.msk.f32.mxu1 %vm344_vm0, %v897_v61  ;;  %2105 = vmatprep.subr.mxu0 %v1181_v62 }
 0x5d8   : > { %2085 = vmatmul.mubr.msk.f32.gmra.mxu1 %vm344_vm0, %v898_v63  ;;  %2106 = vmatpush3.msra.mxu0 %v1181_v62 }
 0x5d9   : > { %2095 = vmatprep.mubr.msk.f32.mxu1 %vm466_vm1, %v1014_v53 }
 0x5da   : > { %v1179_v0 = vpop.permute.xlu1 %1178 }
 0x5db   : > { %2107 = vmatprep.subr.mxu0 %v1179_v0 }
 0x5dc   : > { %2096 = vmatmul.mubr.msk.f32.vlgmr.msra.gmra.mxu1 %vm466_vm1, %v1016_v54  ;;  %2108 = vmatpush3.msra.mxu0 %v1179_v0 }
 0x5dd   : > { %2098 = vmatprep.mubr.msk.f32.mxu1 %vm466_vm1, %v1018_v55 }
 0x5e0   : > { %2099 = vmatmul.mubr.msk.f32.gmra.mxu1 %vm466_vm1, %v1020_v56 }
 0x663   : > { %v2725_v1 = vpop.f32.mrf.mxu1 }
 0x665   : > { %v2727_v2 = vpop.f32.mrf.mxu1 }
 0x698   : > { %v2729_v3 = vpop.f32.mrf.mxu1 }
 0x69a   : > { %v2731_v4 = vpop.f32.mrf.mxu1 }
 0x69c   : > { %v2097_v6 = vpop.f32.mrf.mxu1 }
 0x69d   : > { %v1117_v8 = vadd.f32 %v2097_v6, %v1892_v5 }
 0x69e   : > { %v1111_v9 = vpop.f32.mrf.mxu1 }
 0x69f   : > { %v1112_v13 = vadd.f32 %v1891_v7, %v1111_v9  ;;  %v1131_v16 = vadd.f32 %v1117_v8, %v2611_v32 }
 0x6a0   : > { %v2100_v18 = vpop.f32.mrf.mxu1 }
 0x6a1   : > { %v1127_v20 = vadd.f32 %v2100_v18, %v1894_v11  ;;  %v1137_v21 = vsel %vm344_vm0, %v1131_v16, -inf  ;;  %v1130_v22 = vadd.f32 %v1112_v13, %v2616_v36 }
 0x6a2   : > { %1138 = vmax.xlane.f32.xlu1 %v1137_v21  ;;  %v1121_v23 = vpop.f32.mrf.mxu1 }
 0x6a3   : > { %v1122_v24 = vadd.f32 %v1893_v19, %v1121_v23  ;;  %v1134_v25 = vsel %vm344_vm0, %v1130_v22, -inf  ;;  %v1133_v29 = vadd.f32 %v1127_v20, %v2622_v41 }
 0x6a4   : > { %1135 = vmax.xlane.f32.xlu0 %v1134_v25 }
 0x6a5   : > { %v1143_v30 = vsel %vm344_vm0, %v1133_v29, -inf  ;;  %v1132_v31 = vadd.f32 %v1122_v24, %v2628_v49 }
 0x6a7   : > { %v1140_v33 = vsel %vm344_vm0, %v1132_v31, -inf }
 0x6a8   : > { %1144 = vmax.xlane.f32.xlu0 %v1143_v30 }
 0x6ac   : > { %1141 = vmax.xlane.f32.xlu0 %v1140_v33 }
 0x6b3   : > { %1304 = vrot.lane.b32.xlu1 %v2570_v17, %s2409_s22 }
 0x6c2   : > { %1306 = vrot.lane.b32.xlu0 %v2561_v14, %s2409_s22 }
 0x72b   : > { %v1139_v34 = vpop.xlane.xlu1 %1138 }
 0x72c   : > { %v1147_v35 = vsub.f32 %v1131_v16, %v1139_v34 }
 0x72d   : > { %v1136_v37 = vpop.xlane.xlu0 %1135 }
 0x72e   : > { %v1152_v38 = vmul.f32 1.442695, %v1147_v35  ;;  %v1146_v39 = vsub.f32 %v1130_v22, %v1136_v37 }
 0x72f   : > { %v1305_v62 = vpop.permute.xlu1 %1304 }
 0x730   : > { %2275 = vpow2.f32 %v1152_v38  ;;  %v1150_v40 = vmul.f32 1.442695, %v1146_v39  ;;  %v1910_v38 = vld [vmem:[%s2934_s3 + $0x78] sm:$0xff] }
 0x731   : > { %v1145_v42 = vpop.xlane.xlu0 %1144 }
 0x732   : > { %2277 = vpow2.f32 %v1150_v40  ;;  %v1149_v54 = vsub.f32 %v1133_v29, %v1145_v42  ;;  %v1908_v29 = vld [vmem:[%s2934_s3 + $0x68] sm:$0xff]  ;;  %v1909_v40 = vld [vmem:[%s2934_s3 + $0x70] sm:$0xff] }
 0x734   : > { %v1156_v56 = vmul.f32 1.442695, %v1149_v54 }
 0x735   : > { %v1142_v43 = vpop.xlane.xlu0 %1141 }
 0x736   : > { %v1148_v55 = vsub.f32 %v1132_v31, %v1142_v43  ;;  %2279 = vpow2.f32 %v1156_v56  ;;  %v1907_v31 = vld [vmem:[%s2934_s3 + $0x60] sm:$0xff] }
 0x738   : > { %v1154_v57 = vmul.f32 1.442695, %v1148_v55 }
 0x739   : > { %v1307_v48 = vpop.permute.xlu0 %1306 }
 0x73a   : > { %2115 = vmatprep.subr.msk.mxu0 %vm466_vm1, %v1307_v48  ;;  %2281 = vpow2.f32 %v1154_v57 }
 0x73d   : > { %v2276_v50 = vpop.eup %2275 }
 0x73e   : > { %v1161_v51 = vsel %vm344_vm0, %v2276_v50, 0.0 }
 0x73f   : > { %v2278_v52 = vpop.eup %2277  ;;  %1162 = vadd.xlane.f32.xlu0 %v1161_v51 }
 0x740   : > { %v1158_v53 = vsel %vm344_vm0, %v2278_v52, 0.0 }
 0x741   : > { %1159 = vadd.xlane.f32.xlu1 %v1158_v53 }
 0x743   : > { %v2280_v58 = vpop.eup %2279 }
 0x744   : > { %v1167_v60 = vsel %vm344_vm0, %v2280_v58, 0.0 }
 0x747   : > { %v2282_v59 = vpop.eup %2281 }
 0x748   : > { %v1164_v61 = vsel %vm344_vm0, %v2282_v59, 0.0 }
 0x752   : > { %1300 = vrot.lane.b32.xlu1 %v2558_v12, %s2409_s22 }
 0x755   : > { %1302 = vrot.lane.b32.xlu0 %v2556_v10, %s2409_s22  ;;  %s2939_s22 = smov 8  }
 0x774   : > { %1168 = vadd.xlane.f32.xlu0 %v1167_v60 }
 0x776   : > { %1165 = vadd.xlane.f32.xlu1 %v1164_v61 }
 0x787   : > { %1294 = vrot.lane.b32.xlu1 %v2586_v26, %s2410_s28 }
 0x78a   : > { %1292 = vrot.lane.b32.xlu0 %v2564_v15, %s2410_s28 }
 0x78b   : > { %1298 = vrot.lane.b32.xlu1 %v2596_v28, %s2410_s28 }
 0x78e   : > { %1296 = vrot.lane.b32.xlu0 %v2589_v27, %s2410_s28  ;;  %s2413_s28 = smov 16  }
 0x7c8   : > { %v1163_v63 = vpop.xlane.xlu0 %1162 }
 0x7c9   : > { %2283 = vrcp.f32 %v1163_v63 }
 0x7ca   : > { %v1160_v0 = vpop.xlane.xlu1 %1159 }
 0x7cb   : > { %2285 = vrcp.f32 %v1160_v0 }
 0x7cc   : > { %v1303_v15 = vpop.permute.xlu0 %1302 }
 0x7ce   : > { %v1301_v26 = vpop.permute.xlu1 %1300 }
 0x7d6   : > { %v2284_v5 = vpop.eup %2283 }
 0x7d7   : > { %v1175_v8 = vmul.f32 %v2284_v5, %v2276_v50 }
 0x7d8   : > { %v2286_v6 = vpop.eup %2285 }
 0x7d9   : > { %v1174_v7 = vmul.f32 %v2286_v6, %v2278_v52 }
 0x7db   : > { %2109 = vmatprep.mubr.msk.f32.mxu0 %vm344_vm0, %v1174_v7 }
 0x7dc   : > { %2110 = vmatmul.mubr.msk.f32.vlgmr.msra.gmra.mxu0 %vm344_vm0, %v1175_v8 }
 0x7dd   : > { %2116 = vmatpush3.xpose.msk.msra.mxu0 %vm466_vm1, %v1307_v48 }
 0x7de   : > { %2117 = vmatprep.subr.msk.mxu0 %vm466_vm1, %v1305_v62 }
 0x7e1   : > { %2118 = vmatpush3.xpose.msk.msra.mxu0 %vm466_vm1, %v1305_v62 }
 0x7e2   : > { %2119 = vmatprep.subr.msk.mxu0 %vm466_vm1, %v1303_v15 }
 0x7e5   : > { %2120 = vmatpush3.xpose.msk.msra.mxu0 %vm466_vm1, %v1303_v15 }
 0x7e6   : > { %2121 = vmatprep.subr.msk.mxu0 %vm466_vm1, %v1301_v26 }
 0x7e9   : > { %2122 = vmatpush3.xpose.msk.msra.mxu0 %vm466_vm1, %v1301_v26 }
 0x7fd   : > { %v1169_v27 = vpop.xlane.xlu0 %1168 }
 0x7fe   : > { %2287 = vrcp.f32 %v1169_v27 }
 0x7ff   : > { %v1166_v28 = vpop.xlane.xlu1 %1165 }
 0x800   : > { %2289 = vrcp.f32 %v1166_v28 }
 0x801   : > { %v1293_v16 = vpop.permute.xlu0 %1292 }
 0x803   : > { %v1295_v19 = vpop.permute.xlu1 %1294 }
 0x805   : > { %v1297_v20 = vpop.permute.xlu0 %1296 }
 0x807   : > { %v1299_v21 = vpop.permute.xlu1 %1298 }
 0x80b   : > { %v2288_v9 = vpop.eup %2287 }
 0x80c   : > { %v1177_v18 = vmul.f32 %v2288_v9, %v2280_v58 }
 0x80d   : > { %v2290_v11 = vpop.eup %2289 }
 0x80e   : > { %v1176_v13 = vmul.f32 %v2290_v11, %v2282_v59 }
 0x810   : > { %2112 = vmatprep.mubr.msk.f32.mxu0 %vm344_vm0, %v1176_v13 }
 0x811   : > { %2113 = vmatmul.mubr.msk.f32.gmra.mxu0 %vm344_vm0, %v1177_v18 }
 0x812   : > { %2123 = vmatprep.mubr.msk.f32.mxu0 %vm466_vm1, %v1293_v16 }
 0x815   : > { %2124 = vmatmul.mubr.msk.f32.vlgmr.msra.gmra.mxu0 %vm466_vm1, %v1295_v19 }
 0x816   : > { %2126 = vmatprep.mubr.msk.f32.mxu0 %vm466_vm1, %v1297_v20 }
 0x819   : > { %2127 = vmatmul.mubr.msk.f32.gmra.mxu0 %vm466_vm1, %v1299_v21 }
 0x89c   : > { %v2781_v22 = vpop.f32.mrf.mxu0 }
 0x89e   : > { %v1268_v23 = vpop.f32.mrf.mxu0 }
 0x8d1   : > { %v2783_v24 = vpop.f32.mrf.mxu0 }
 0x8d3   : > { %v1278_v25 = vpop.f32.mrf.mxu0 }
 0x8d5   : > { %v2125_v30 = vpop.f32.mrf.mxu0 }
 0x8d6   : > { %v1396_v33 = vadd.f32 %v2125_v30, %v1908_v29 }
 0x8d7   : > { %v1390_v34 = vpop.f32.mrf.mxu0 }
 0x8d8   : > { %v1391_v35 = vadd.f32 %v1907_v31, %v1390_v34  ;;  %v1410_v37 = vadd.f32 %v1396_v33, %v2611_v32 }
 0x8d9   : > { %v2128_v39 = vpop.f32.mrf.mxu0 }
 0x8da   : > { %v1416_v42 = vsel %vm344_vm0, %v1410_v37, -inf  ;;  %v1409_v43 = vadd.f32 %v1391_v35, %v2616_v36  ;;  %v1406_v50 = vadd.f32 %v2128_v39, %v1910_v38 }
 0x8db   : > { %1417 = vmax.xlane.f32.xlu1 %v1416_v42  ;;  %v1400_v48 = vpop.f32.mrf.mxu0 }
 0x8dc   : > { %v1401_v51 = vadd.f32 %v1909_v40, %v1400_v48  ;;  %v1413_v52 = vsel %vm344_vm0, %v1409_v43, -inf  ;;  %v1412_v54 = vadd.f32 %v1406_v50, %v2622_v41 }
 0x8dd   : > { %1414 = vmax.xlane.f32.xlu0 %v1413_v52 }
 0x8de   : > { %v1411_v32 = vadd.f32 %v1401_v51, %v2628_v49  ;;  %v1422_v55 = vsel %vm344_vm0, %v1412_v54, -inf }
 0x8e0   : > { %v1419_v53 = vsel %vm344_vm0, %v1411_v32, -inf }
 0x8e1   : > { %1420 = vmax.xlane.f32.xlu0 %v1419_v53 }
 0x8e5   : > { %1423 = vmax.xlane.f32.xlu0 %v1422_v55 }
 0x8ec   : > { %1463 = vrot.lane.b32.xlu1 %v2561_v14, %s2411_s20 }
 0x964   : > { %v1418_v36 = vpop.xlane.xlu1 %1417 }
 0x965   : > { %v1426_v56 = vsub.f32 %v1410_v37, %v1418_v36 }
 0x966   : > { %v1415_v57 = vpop.xlane.xlu0 %1414 }
 0x967   : > { %v1431_v58 = vmul.f32 1.442695, %v1426_v56  ;;  %v1425_v59 = vsub.f32 %v1409_v43, %v1415_v57 }
 0x968   : > { %v1464_v60 = vpop.permute.xlu1 %1463 }
 0x969   : > { %2291 = vpow2.f32 %v1431_v58  ;;  %v1429_v49 = vmul.f32 1.442695, %v1425_v59  ;;  %2129 = vmatprep.subr.mxu1 %v1464_v60 }
 0x96a   : > { %2130 = vmatpush3.msra.mxu1 %v1464_v60  ;;  %v1421_v61 = vpop.xlane.xlu0 %1420 }
 0x96b   : > { %2293 = vpow2.f32 %v1429_v49  ;;  %v1427_v15 = vsub.f32 %v1411_v32, %v1421_v61 }
 0x96d   : > { %v1433_v26 = vmul.f32 1.442695, %v1427_v15 }
 0x96e   : > { %v1424_v41 = vpop.xlane.xlu0 %1423 }
 0x96f   : > { %v1428_v62 = vsub.f32 %v1412_v54, %v1424_v41 }
 0x971   : > { %v1435_v63 = vmul.f32 1.442695, %v1428_v62 }
 0x973   : > { %2295 = vpow2.f32 %v1435_v63 }
 0x974   : > { %2297 = vpow2.f32 %v1433_v26 }
 0x976   : > { %v2292_v0 = vpop.eup %2291 }
 0x977   : > { %v1440_v5 = vsel %vm344_vm0, %v2292_v0, 0.0 }
 0x978   : > { %v2294_v14 = vpop.eup %2293  ;;  %1441 = vadd.xlane.f32.xlu0 %v1440_v5 }
 0x979   : > { %v1437_v6 = vsel %vm344_vm0, %v2294_v14, 0.0 }
 0x97a   : > { %1438 = vadd.xlane.f32.xlu1 %v1437_v6 }
 0x980   : > { %v2296_v7 = vpop.eup %2295 }
 0x981   : > { %v1446_v8 = vsel %vm344_vm0, %v2296_v7, 0.0  ;;  %v2298_v27 = vpop.eup %2297 }
 0x982   : > { %1447 = vadd.xlane.f32.xlu0 %v1446_v8  ;;  %v1443_v28 = vsel %vm344_vm0, %v2298_v27, 0.0 }
 0x98b   : > { %1459 = vrot.lane.b32.xlu1 %v2556_v10, %s2411_s20 }
 0x998   : > { %1461 = vrot.lane.b32.xlu0 %v2570_v17, %s2411_s20 }
 0x99c   : > { %1570 = vrot.lane.b32.xlu0 %v2727_v2, %s2939_s22 }
 0x9a0   : > { %1586 = vrot.lane.b32.xlu0 %v1268_v23, %s2413_s28  ;;  %v1630_v23 = vld [vmem:[%s2936_s5 + $0x10] sm:$0xff] }
 0x9a4   : > { %1574 = vrot.lane.b32.xlu0 %v2731_v4, %s2939_s22 }
 0x9a8   : > { %1590 = vrot.lane.b32.xlu0 %v1278_v25, %s2413_s28  ;;  %v1628_v25 = vld [vmem:[%s2936_s5] sm:$0xff] }
 0x9af   : > { %1444 = vadd.xlane.f32.xlu1 %v1443_v28 }
 0x9c0   : > { %1457 = vrot.lane.b32.xlu1 %v2558_v12, %s2411_s20  ;;  %s2414_s20 = smov 24  }
 0x9c4   : > { %1572 = vrot.lane.b32.xlu1 %v2725_v1, %s2939_s22 }
 0x9c8   : > { %1588 = vrot.lane.b32.xlu1 %v2781_v22, %s2413_s28  ;;  %v1631_v22 = vld [vmem:[%s2936_s5 + $0x18] sm:$0xff] }
 0x9cc   : > { %1576 = vrot.lane.b32.xlu1 %v2729_v3, %s2939_s22 }
 0x9d0   : > { %1592 = vrot.lane.b32.xlu1 %v2783_v24, %s2413_s28  ;;  %v1629_v24 = vld [vmem:[%s2936_s5 + $0x8] sm:$0xff]  ;;  %s310_s28 = sand.u32 1, %s2375_s25  }
 0x9d1   : > { %s1852_s23 = sshll.u32 %s310_s28, 5  ;;  %s2879_s17 = scalar_lea.sflag [#allocation3], %s310_s28 }
 0x9d2   : > { %s312_s13 = scalar_lea.vmem [#allocation2], %s1852_s23 }
 0x9d3   : > { %s1756_s18 = sshll.u32 %s312_s13, 4  ;;  %s2875_s18 = int_to_ptr.vmem [resolvable:$true] %s1756_s18 }
 0x9d4   : > { %s2307_s23 = scalar_lea.vmem %s2875_s18, 512  ;;  %p2314_p3 = scmp.lt.s32.totalorder %s2875_s18, %s2312_s12 }
 0x9d5   : > { %p2308_p0 = scmp.ne.s32.totalorder %s2875_s18, %s2307_s23 }
 0x9d7   : > { %p2309_p1 = pnand %p2308_p0, %p2510_p5 }
 0x9d9   : > { %p2310_p2 = pneg %p2309_p1 }
 0xa01   : > { %v1442_v17 = vpop.xlane.xlu0 %1441 }
 0xa03   : > { %v1439_v10 = vpop.xlane.xlu1 %1438 }
 0xa04   : > { %2299 = vrcp.f32 %v1439_v10 }
 0xa05   : > { %2301 = vrcp.f32 %v1442_v17 }
 0xa07   : > { %v1460_v11 = vpop.permute.xlu1 %1459 }
 0xa0b   : > { %v1448_v2 = vpop.xlane.xlu0 %1447 }
 0xa0c   : > { %2303 = vrcp.f32 %v1448_v2 }
 0xa0f   : > { %v1462_v4 = vpop.permute.xlu0 %1461 }
 0xa10   : > { %2131 = vmatprep.subr.mxu1 %v1462_v4 }
 0xa11   : > { %v2300_v9 = vpop.eup %2299  ;;  %2132 = vmatpush3.msra.mxu1 %v1462_v4 }
 0xa12   : > { %2133 = vmatprep.subr.mxu1 %v1460_v11  ;;  %v1453_v12 = vmul.f32 %v2300_v9, %v2294_v14  ;;  %v2302_v3 = vpop.eup %2301 }
 0xa13   : > { %2134 = vmatpush3.msra.mxu1 %v1460_v11  ;;  %v1454_v16 = vmul.f32 %v2302_v3, %v2292_v0  ;;  %v1571_v35 = vpop.permute.xlu0 %1570 }
 0xa14   : > { %2137 = vmatprep.mubr.msk.f32.mxu1 %vm344_vm0, %v1453_v12  ;;  %v1614_v48 = vsel %vm466_vm1, %v2667_v45, %v1571_v35 }
 0xa17   : > { %v1587_v38 = vpop.permute.xlu0 %1586 }
 0xa18   : > { %v1619_v51 = vsel %vm1618_vm2, %v1614_v48, %v1587_v38 }
 0xa19   : > { %v2304_v18 = vpop.eup %2303 }
 0xa1a   : > { %v1456_v21 = vmul.f32 %v2304_v18, %v2296_v7 }
 0xa1b   : > { %v1575_v40 = vpop.permute.xlu0 %1574 }
 0xa1c   : > { %v1616_v45 = vsel %vm466_vm1, %v2671_v47, %v1575_v40  ;;  %v1923_v47 = vld [vmem:[%s2937_s6] ss:$0 sm:$0xff] }
 0xa1f   : > { %v1591_v43 = vpop.permute.xlu0 %1590 }
 0xa20   : > { %v1621_v56 = vsel %vm1618_vm2, %v1616_v45, %v1591_v43 }
 0xa38   : > { %v1445_v1 = vpop.xlane.xlu1 %1444 }
 0xa39   : > { %2305 = vrcp.f32 %v1445_v1 }
 0xa3c   : > { %v1458_v13 = vpop.permute.xlu1 %1457 }
 0xa3d   : > { %2135 = vmatprep.subr.mxu1 %v1458_v13 }
 0xa3e   : > { %2136 = vmatpush3.msra.mxu1 %v1458_v13 }
 0xa3f   : > { %2138 = vmatmul.mubr.msk.f32.vlgmr.msra.gmra.mxu1 %vm344_vm0, %v1454_v16  ;;  %2143 = vmatprep.subr.mxu1 %v1631_v22 }
 0xa40   : > { %2144 = vmatpush3.msra.mxu1 %v1631_v22  ;;  %v1573_v34 = vpop.permute.xlu1 %1572 }
 0xa41   : > { %2145 = vmatprep.subr.mxu1 %v1630_v23  ;;  %v1615_v52 = vsel %vm466_vm1, %v2665_v44, %v1573_v34 }
 0xa42   : > { %2146 = vmatpush3.msra.mxu1 %v1630_v23 }
 0xa43   : > { %2147 = vmatprep.subr.mxu1 %v1629_v24 }
 0xa44   : > { %2148 = vmatpush3.msra.mxu1 %v1629_v24  ;;  %v1589_v37 = vpop.permute.xlu1 %1588 }
 0xa45   : > { %2149 = vmatprep.subr.mxu1 %v1628_v25  ;;  %v1620_v53 = vsel %vm1618_vm2, %v1615_v52, %v1589_v37 }
 0xa46   : > { %v2306_v19 = vpop.eup %2305  ;;  %2150 = vmatpush3.msra.mxu1 %v1628_v25 }
 0xa47   : > { %v1455_v20 = vmul.f32 %v2306_v19, %v2298_v27 }
 0xa48   : > { %v1577_v39 = vpop.permute.xlu1 %1576 }
 0xa49   : > { %2140 = vmatprep.mubr.msk.f32.mxu1 %vm344_vm0, %v1455_v20  ;;  %v1617_v44 = vsel %vm466_vm1, %v2669_v46, %v1577_v39 }
 0xa4a   : > { %2141 = vmatmul.mubr.msk.f32.gmra.mxu1 %vm344_vm0, %v1456_v21 }
 0xa4c   : > { %v1593_v42 = vpop.permute.xlu1 %1592 }
 0xa4d   : > { %v1622_v58 = vsel %vm1618_vm2, %v1617_v44, %v1593_v42 }
 0xaff   : > { %v2139_v29 = vpop.f32.mrf.mxu1 }
 0xb00   : > { %1604 = vrot.lane.b32.xlu1 %v2139_v29, %s2414_s20 }
 0xb01   : > { %v1547_v30 = vpop.f32.mrf.mxu1 }
 0xb02   : > { %1602 = vrot.lane.b32.xlu0 %v1547_v30, %s2414_s20 }
 0xb0a   : > { %v2142_v31 = vpop.f32.mrf.mxu1 }
 0xb0b   : > { %1608 = vrot.lane.b32.xlu1 %v2142_v31, %s2414_s20 }
 0xb0c   : > { %v1557_v33 = vpop.f32.mrf.mxu1 }
 0xb0d   : > { %1606 = vrot.lane.b32.xlu0 %v1557_v33, %s2414_s20  ;;  %s2873_s20 = scalar_lea.hbm %s2938_s7, %s1936_s14  ;;  %s2313_s14 = scalar_lea.vmem %s2312_s12, 1024 }
 0xb0e   : > { %p2315_p4 = scmp.lt.s32.totalorder %s2313_s14, %s2307_s23 }
 0xb10   : > { %p2316_p6 = por %p2315_p4, %p2314_p3 }
 0xb12   : > { %p2317_p8 = pnand %p2316_p6, %p2310_p2 }
 0xb72   : > { %v1605_v50 = vpop.permute.xlu1 %1604 }
 0xb73   : > { %v1625_v55 = vsel %vm1623_vm3, %v1620_v53, %v1605_v50 }
 0xb74   : > { %v1603_v32 = vpop.permute.xlu0 %1602 }
 0xb75   : > { %v1624_v54 = vsel %vm1623_vm3, %v1619_v51, %v1603_v32 }
 0xb76   : > { %2151 = vmatprep.mubr.msk.f32.mxu1 %vm344_vm0, %v1624_v54 }
 0xb77   : > { %2152 = vmatmul.mubr.msk.f32.vlgmr.msra.gmra.mxu1 %vm344_vm0, %v1625_v55 }
 0xb7d   : > { %v1609_v36 = vpop.permute.xlu1 %1608 }
 0xb7e   : > { %v1627_v60 = vsel %vm1623_vm3, %v1622_v58, %v1609_v36 }
 0xb7f   : > { %v1607_v57 = vpop.permute.xlu0 %1606 }
 0xb80   : > { %v1626_v59 = vsel %vm1623_vm3, %v1621_v56, %v1607_v57 }
 0xb81   : > { %2154 = vmatprep.mubr.msk.f32.mxu1 %vm344_vm0, %v1626_v59 }
 0xb82   : > { %2155 = vmatmul.mubr.msk.f32.gmra.mxu1 %vm344_vm0, %v1627_v60 }
 0xc37   : > { %v2153_v49 = vpop.f32.mrf.mxu1 }
 0xc38   : > { %v1723_v46 = vadd.f32 %v2153_v49, %v1923_v47 }
 0xc39   : > { %v1717_v61 = vpop.f32.mrf.mxu1 }
 0xc3a   : > { %1737 = vst.msk [vmem:[%s312_s13 + $0x8] sm:$0xff] %vm344_vm0, %v1723_v46  ;;  %v1718_v41 = vadd.f32 %v1923_v47, %v1717_v61 }
 0xc3c   : > { %1736 = vst.msk [vmem:[%s312_s13] sm:$0xff] %vm344_vm0, %v1718_v41 }
 0xc42   : > { %v2156_v62 = vpop.f32.mrf.mxu1 }
 0xc43   : > { %v1733_v63 = vadd.f32 %v2156_v62, %v1923_v47 }
 0xc44   : > { %v1727_v0 = vpop.f32.mrf.mxu1 }
 0xc45   : > { %1739 = vst.msk [vmem:[%s312_s13 + $0x18] sm:$0xff] %vm344_vm0, %v1733_v63  ;;  %v1728_v5 = vadd.f32 %v1923_v47, %v1727_v0 }
 0xc47   : > { %1738 = vst.msk [vmem:[%s312_s13 + $0x10] sm:$0xff] %vm344_vm0, %v1728_v5 }
 0xc48   : > { %2320 = shalt.err (!%p2317_p8)
}
 0xc49   : > { %s2321_s28 = scalar_lea.hbm %s2873_s20, 512  ;;  %s2325_s27 = scalar_lea.hbm %s2938_s7, 2048 }
 0xc4a   : > { %p2322_p9 = scmp.ne.s32.totalorder %s2873_s20, %s2321_s28  ;;  %p2326_p12 = scmp.lt.s32.totalorder %s2873_s20, %s2938_s7 }
 0xc4b   : > { %p2327_p13 = scmp.lt.s32.totalorder %s2325_s27, %s2321_s28 }
 0xc4c   : > { %p2323_p10 = pnand %p2322_p9, %p2510_p5 }
 0xc4d   : > { %p2328_p0 = por %p2327_p13, %p2326_p12 }
 0xc4e   : > { %p2324_p11 = pneg %p2323_p10 }
 0xc50   : > { %p2329_p1 = pnand %p2328_p0, %p2324_p11 }
 0xc52   : > { %2332 = shalt.err (!%p2329_p1)
}
 0xc53   : > { %s2416_s23 = smov 128   ;;  %s2942_s12 = smov 8  }
 0xc54   : > { %2157 = dma.vmem_to_hbm [thread:$0]  (%p2510_p5), %s2875_s18, 512, %s2873_s20, %s2879_s17, %s2416_s23, %s2416_s23, %s2942_s12  }
 0xc55 PF: > { %p2163_p2 = scmp.ge.s32.totalorder %s2399_s8, 2  ;;  %s1771_s14 = sand.u32 1, %s2371_s24  }
 0xc56   : > { %s1772_s22 = scalar_lea.sflag [#allocation3], %s1771_s14 }
 0xc57   : > { %p2160_p3 = pnand %p2163_p2, %p2516_p7 }
 0xc59   : > { %p2161_p4 = pneg %p2160_p3 }
 0xc5b   : > { %2366 = dma.done.wait (%p2161_p4), %s1772_s22, 512  }
 0xc5c   : > { %2368 = vsyncadd (%p2161_p4), %s1772_s22, 4294966784  ;;  %s20_s8 = sadd.s32 1, %s2399_s8   ;;  %s2943_s24 = smov %s2375_s25 }
 0xc5d   : > { %p17_p6 = scmp.ge.s32.totalorder %s20_s8, 6   ;;  %s2944_s25 = smov %s2379_s26 }
 0xc5e   : > { %s2945_s26 = smov %s2526_s21  ;;  %s2946_s27 = smov %s2391_s29 }
 0xc5f   : > { %s2947_s28 = smov %s2395_s30  ;;  %s2948_s29 = smov %s2951_s10 }
 0xc60   : > { %s2949_s30 = smov %s2955_s11  ;;  %19 = sbr.rel (!%p17_p6) target bundleno = 5 (0x5), region = 89 }
 0xc65   :  { %1777 = vsyncpa [#allocation3], 1 }
 0xc66   :  { %1779 = vsyncpa [#allocation3 + $0x1], 1 }

</bundles_post_ra>
